<compile_context>
chip_gen: v7x
topology: tpu7x:2x2x1
jax: 0.10.0
libtpu: 0.0.40
codegen_flags: <defaults>
</compile_context>

<pallas_src>
import functools

import jax
import jax.numpy as jnp
from jax.experimental import pallas as pl
from jax.experimental.pallas import tpu as pltpu


# ---------------------------------------------------------------------------
# Kernel
# ---------------------------------------------------------------------------
def _fused_heads_kernel(x_ref, w_ref, scale_ref, o_ref):
    # Cast x to bf16 in-kernel (x streams in as f32; cast is free VPU filler).
    x_bf16 = x_ref[...].astype(jnp.bfloat16)
    # One fused MXU matmul over all heads [w1 | w2 | wn | pad], f32 accumulate.
    acc = jnp.dot(x_bf16, w_ref[...], preferred_element_type=jnp.float32)
    # Temperature scaling: single broadcast multiply by precomputed
    # reciprocals (fn columns and padding carry scale 1.0).  Cast on store.
    o_ref[...] = (acc * scale_ref[...]).astype(o_ref.dtype)


# ---------------------------------------------------------------------------
# One-time parameter preparation (hoisted out of the per-call path)
# ---------------------------------------------------------------------------
def prepare_params(w1, w2, wn, temperatures):
    """Pack head weights into one bf16 matrix and build the 1/T scale row.

    Call once at module init (and again only if temperatures change).
    Returns (w_bf16[D, c_pad], scale[1, c_pad] f32, (c1, c2, cn)).
    """
    c1, c2, cn = w1.shape[1], w2.shape[1], wn.shape[1]
    c_total = c1 + c2 + cn
    # Pad fused class axis to a multiple of 128 -> lane-dense, unmasked stores.
    c_pad = max(128, ((c_total + 127) // 128) * 128)

    w_fused = jnp.concatenate([w1, w2, wn], axis=1)
    w_fused = jnp.pad(w_fused, ((0, 0), (0, c_pad - c_total)))
    w_bf16 = w_fused.astype(jnp.bfloat16)

    inv_t1 = (1.0 / temperatures[0].reshape(())).astype(jnp.float32)
    inv_t2 = (1.0 / temperatures[1].reshape(())).astype(jnp.float32)
    scale = jnp.concatenate([
        jnp.full((c1,), inv_t1, jnp.float32),
        jnp.full((c2,), inv_t2, jnp.float32),
        jnp.ones((cn + (c_pad - c_total),), jnp.float32),
    ]).reshape(1, c_pad)

    return w_bf16, scale, (c1, c2, cn)


def _choose_tile_b(B, tile_b):
    """Batch tile: multiple of 16, >=2 tiles when the batch allows it (v7x)."""
    if B <= 16:
        return B                      # single full-batch tile; too small to split
    if B <= tile_b:
        # Split into (at least) two tiles so both v7x TensorCores get work.
        half = (B + 1) // 2
        return max(16, ((half + 15) // 16) * 16)
    return tile_b


# ---------------------------------------------------------------------------
# Forward
# ---------------------------------------------------------------------------
@functools.partial(jax.jit, static_argnames=("tile_b", "out_dtype"))
def fused_temperature_forward(x, w_bf16, scale, *, tile_b=1024,
                              out_dtype=jnp.bfloat16):
    """Fused heads + temperature scaling.

    Returns the padded logits slab of shape (B, c_pad) in `out_dtype`
    (columns: [f1/T1 | f2/T2 | fn | zero-pad]).  Slice with `split_logits`
    only where the individual heads are consumed.
    """
    B, D = x.shape
    c_pad = w_bf16.shape[1]

    tb = _choose_tile_b(B, tile_b)
    n_tiles = pl.cdiv(B, tb)
    # No batch padding: the last tile may overrun; Pallas masks writes of the
    # out-of-range rows.  (Garbage rows read there never reach the output —
    # safe ONLY because there is no row-reduction in the kernel.)

    out = pl.pallas_call(
        _fused_heads_kernel,
        out_shape=jax.ShapeDtypeStruct((B, c_pad), out_dtype),
        grid_spec=pltpu.PrefetchScalarGridSpec(
            num_scalar_prefetch=0,
            grid=(n_tiles,),
            in_specs=[
                pl.BlockSpec((tb, D), lambda i: (i, 0)),      # x tile (f32)
                pl.BlockSpec((D, c_pad), lambda i: (0, 0)),   # W resident (bf16)
                pl.BlockSpec((1, c_pad), lambda i: (0, 0)),   # 1/T row resident
            ],
            out_specs=pl.BlockSpec((tb, c_pad), lambda i: (i, 0)),
        ),
        compiler_params=pltpu.CompilerParams(
            dimension_semantics=("parallel",),
            # Tiny footprint at these shapes; budget leaves headroom even on
            # v7x's 64 MiB VMEM.
            # TODO(synk): if D or the fused class count grows (vocab-sized
            # heads), add K/N grid axes with a VMEM accumulator instead of
            # keeping W fully resident.
            vmem_limit_bytes=48 * 1024 * 1024,
        ),
    )(x, w_bf16, scale)
    return out


def split_logits(out, sizes):
    """Slice the fused slab into (f1, f2, fn) — only call where consumed."""
    c1, c2, cn = sizes
    return out[:, :c1], out[:, c1:c1 + c2], out[:, c1 + c2:c1 + c2 + cn]


def model_with_temperature_forward(x, w1, w2, wn, temperatures, *,
                                   tile_b=1024, out_dtype=jnp.bfloat16):
    """Convenience wrapper matching the module's (f1/T1, f2/T2, fn) signature.

    Prefer calling `prepare_params` once + `fused_temperature_forward` per
    step and deferring `split_logits` to the consumer.
    """
    w_bf16, scale, sizes = prepare_params(w1, w2, wn, temperatures)
    out = fused_temperature_forward(x, w_bf16, scale, tile_b=tile_b,
                                    out_dtype=out_dtype)
    return split_logits(out, sizes)


if __name__ == "__main__":
    key = jax.random.PRNGKey(0)
    k_x, k_w1, k_w2, k_wn = jax.random.split(key, 4)

    # Small shapes consistent with a classification forward pass.
    B, D = 8, 32
    C1, C2, CN = 16, 16, 16

    x = jax.random.normal(k_x, (B, D), dtype=jnp.float32)
    w1 = jax.random.normal(k_w1, (D, C1), dtype=jnp.float32) * 0.1
    w2 = jax.random.normal(k_w2, (D, C2), dtype=jnp.float32) * 0.1
    wn = jax.random.normal(k_wn, (D, CN), dtype=jnp.float32) * 0.1

    # Temperatures initialized exactly as in the module: ones(1) * 1.5, twice.
    temperatures = [jnp.ones((1,), jnp.float32) * 1.5,
                    jnp.ones((1,), jnp.float32) * 1.5]

    # One-time param prep (hoisted), then the fused forward.
    w_bf16, scale, sizes = prepare_params(w1, w2, wn, temperatures)
    out = fused_temperature_forward(x, w_bf16, scale)
    jax.block_until_ready(out)

    # Slice only here, where the heads are consumed (verification).
    f1, f2, fn = split_logits(out, sizes)
    f1 = f1.astype(jnp.float32)
    f2 = f2.astype(jnp.float32)
    fn = fn.astype(jnp.float32)

    # Pure-JAX reference with the same bf16 weight/input numerics the kernel
    # uses (bf16 output rounding covered by tolerance).
    xb = x.astype(jnp.bfloat16).astype(jnp.float32)
    w1b = w1.astype(jnp.bfloat16).astype(jnp.float32)
    w2b = w2.astype(jnp.bfloat16).astype(jnp.float32)
    wnb = wn.astype(jnp.bfloat16).astype(jnp.float32)
    f1_ref = (xb @ w1b) / temperatures[0][0]
    f2_ref = (xb @ w2b) / temperatures[1][0]
    fn_ref = xb @ wnb
    assert jnp.allclose(f1, f1_ref, atol=1e-2, rtol=1e-2)
    assert jnp.allclose(f2, f2_ref, atol=1e-2, rtol=1e-2)
    assert jnp.allclose(fn, fn_ref, atol=1e-2, rtol=1e-2)

    print("KERNEL_OK")
</pallas_src>

<mosaic_0001>
module attributes {stable_mosaic.version = 11 : i64} {
  func.func @_fused_heads_kernel(%arg0: i32, %arg1: memref<8x32xf32, #tpu.memory_space<vmem>>, %arg2: memref<32x128xbf16, #tpu.memory_space<vmem>>, %arg3: memref<1x128xf32, #tpu.memory_space<vmem>>, %arg4: memref<8x128xbf16, #tpu.memory_space<vmem>>) attributes {dimension_semantics = [#tpu.dimension_semantics<parallel>], iteration_bounds = array<i64: 1>, scalar_prefetch = 0 : i64, scratch_operands = 0 : i64, tpu.core_type = #tpu.core_type<tc>, window_params = [{transform_indices = @transform_0, window_bounds = array<i64: 8, 32>}, {pipeline_mode = #tpu.pipeline_mode<synchronous>, transform_indices = @transform_1, window_bounds = array<i64: 32, 128>}, {pipeline_mode = #tpu.pipeline_mode<synchronous>, transform_indices = @transform_2, window_bounds = array<i64: 1, 128>}, {transform_indices = @transform_3, window_bounds = array<i64: 8, 128>}]} {
    %c0 = arith.constant 0 : index
    %c0_0 = arith.constant 0 : index
    %0 = vector.load %arg1[%c0, %c0_0] : memref<8x32xf32, #tpu.memory_space<vmem>>, vector<8x32xf32>
    %1 = arith.truncf %0 : vector<8x32xf32> to vector<8x32xbf16>
    %c0_1 = arith.constant 0 : index
    %c0_2 = arith.constant 0 : index
    %2 = vector.load %arg2[%c0_1, %c0_2] : memref<32x128xbf16, #tpu.memory_space<vmem>>, vector<32x128xbf16>
    %cst = arith.constant dense<0.000000e+00> : vector<8x128xf32>
    %3 = tpu.matmul %1, %2, %cst {dimension_numbers = #tpu.dot_dimension_numbers<[1], [0], [0], [1], [0, 0, 1, 1], [], []>} : vector<8x32xbf16>, vector<32x128xbf16>, vector<8x128xf32> -> vector<8x128xf32>
    %c0_3 = arith.constant 0 : index
    %c0_4 = arith.constant 0 : index
    %4 = vector.load %arg3[%c0_3, %c0_4] : memref<1x128xf32, #tpu.memory_space<vmem>>, vector<1x128xf32>
    %5 = vector.broadcast %4 : vector<1x128xf32> to vector<8x128xf32>
    %6 = arith.mulf %3, %5 : vector<8x128xf32>
    %7 = arith.truncf %6 : vector<8x128xf32> to vector<8x128xbf16>
    %c0_5 = arith.constant 0 : index
    %c0_6 = arith.constant 0 : index
    %8 = vector.load %arg4[%c0_5, %c0_6] : memref<8x128xbf16, #tpu.memory_space<vmem>>, vector<8x128xbf16>
    tpu.vector_store %arg4[%c0_5, %c0_6], %7 {strides = array<i32>} : memref<8x128xbf16, #tpu.memory_space<vmem>>, vector<8x128xbf16>,
    return
  }
  func.func @transform_0(%arg0: i32) -> (i32, i32) {
    %c0_i32 = arith.constant 0 : i32
    %c0_i32_0 = arith.constant 0 : i32
    return %arg0, %c0_i32 : i32, i32
  }
  func.func @transform_1(%arg0: i32) -> (i32, i32) {
    %c0_i32 = arith.constant 0 : i32
    %c0_i32_0 = arith.constant 0 : i32
    %c0_i32_1 = arith.constant 0 : i32
    return %c0_i32, %c0_i32_0 : i32, i32
  }
  func.func @transform_2(%arg0: i32) -> (i32, i32) {
    %c0_i32 = arith.constant 0 : i32
    %c0_i32_0 = arith.constant 0 : i32
    %c0_i32_1 = arith.constant 0 : i32
    return %c0_i32, %c0_i32_0 : i32, i32
  }
  func.func @transform_3(%arg0: i32) -> (i32, i32) {
    %c0_i32 = arith.constant 0 : i32
    %c0_i32_0 = arith.constant 0 : i32
    return %arg0, %c0_i32 : i32, i32
  }
}

</mosaic_0001>

<bundles_post_ra>
// kernel: fused_temperature_forward.1
= control target key start
LH: loop header
LB: loop body
LE: loop exit
PB: predicated region body
PF: predicated region fallthrough
CT: control target
= control target key end

     0   :  { %8 = vsyncpa [#allocation3], 0  ;;  %s299_s0 = inlined_call_operand.hbm [shape: f32[8,32], index: 0, kind: input, shape index: {}]   ;;  %s300_s1 = inlined_call_operand.hbm [shape: bf16[32,128], index: 1, kind: input, shape index: {}]   ;;  %s301_s2 = inlined_call_operand.vmem [shape: f32[1,128], index: 2, kind: input, shape index: {}]   ;;  %s302_s3 = inlined_call_operand.hbm [shape: bf16[8,128], index: 3, kind: output, shape index: {}]  }
   0x1   :  { %9 = vsyncpa [#allocation6], 0 }
   0x2   :  { %10 = vsyncpa [#allocation4], 0  ;;  %s226_s12 = smov [#allocation2]   ;;  %s227_s14 = smov [#allocation5]  }
   0x3   :  { %s17_s13 = sshll.u32 %s226_s12, 4  ;;  %s26_s15 = sshll.u32 %s227_s14, 4  ;;  %s18_s13 = int_to_ptr.vmem [resolvable:$true] %s17_s13  ;;  %s253_s15 = int_to_ptr.vmem [resolvable:$true] %s26_s15 }
   0x4   :  { %s154_s18 = scalar_lea.hbm %s299_s0, 128 }
   0x5   :  { %p155_p0 = scmp.ne.s32.totalorder %s299_s0, %s154_s18  ;;  %p158_p1 = scmp.lt.u32.totalorder %s154_s18, %s299_s0 }
   0x7   :  { %p160_p2 = pnand %p158_p1, %p155_p0 }
   0x9   :  { %163 = shalt.err (!%p160_p2)
}
   0xa   :  { %s164_s23 = scalar_lea.vmem %s18_s13, 128  ;;  %p169_p4 = scmp.lt.s32.totalorder %s18_s13, %s18_s13 }
   0xb   :  { %p165_p3 = scmp.ne.s32.totalorder %s18_s13, %s164_s23  ;;  %p170_p5 = scmp.lt.s32.totalorder %s164_s23, %s164_s23 }
   0xd   :  { %p171_p6 = por %p170_p5, %p169_p4 }
   0xf   :  { %p172_p7 = pnand %p171_p6, %p165_p3 }
  0x11   :  { %175 = shalt.err (!%p172_p7)
}
  0x12   :  { %20 = dma.hbm_to_vmem [thread:$0]  %s299_s0, 128, %s18_s13, [#allocation3]  }
  0x13   :  { %s176_s28 = scalar_lea.hbm %s300_s1, 256 }
  0x14   :  { %p177_p8 = scmp.ne.s32.totalorder %s300_s1, %s176_s28  ;;  %p180_p9 = scmp.lt.u32.totalorder %s176_s28, %s300_s1 }
  0x16   :  { %p182_p10 = pnand %p180_p9, %p177_p8 }
  0x18   :  { %185 = shalt.err (!%p182_p10)
}
  0x19   :  { %s186_s6 = scalar_lea.vmem %s253_s15, 256  ;;  %p191_p12 = scmp.lt.s32.totalorder %s253_s15, %s253_s15 }
  0x1a   :  { %p187_p11 = scmp.ne.s32.totalorder %s253_s15, %s186_s6  ;;  %p192_p13 = scmp.lt.s32.totalorder %s186_s6, %s186_s6 }
  0x1c   :  { %p193_p0 = por %p192_p13, %p191_p12 }
  0x1e   :  { %p194_p1 = pnand %p193_p0, %p187_p11 }
  0x20   :  { %197 = shalt.err (!%p194_p1)
}
  0x21   :  { %s228_s0 = smov 64   ;;  %s229_s7 = smov 4  }
  0x22   :  { %32 = dma.hbm_to_vmem [thread:$0]  %s300_s1, 256, %s253_s15, [#allocation6], %s228_s0, %s228_s0, %s229_s7  }
  0x23   :  { %220 = dma.done.wait [#allocation3], 128  }
  0x24   :  { %221 = vsyncadd [#allocation3], 4294967168 }
  0x25   :  { %222 = dma.done.wait [#allocation6], 256  }
  0x26   :  { %223 = vsyncadd [#allocation6], 4294967040  ;;  %v230_v0 = vmov 0.0   ;;  %vm231_vm0 = vmmov 0   ;;  %v152_v1 = vld [vmem:[#allocation5] sm:$0xff]   ;;  %v153_v2 = vld [vmem:[#allocation5 + $0x8] sm:$0xff]  }
  0x27   :  { %137 = vmatprep.subr.bf16.mxu0 %v230_v0  ;;  %141 = vmatprep.mubr.msk.bf16.mxu0 %vm231_vm0, %v230_v0  ;;  %v42_v3 = vld [vmem:[#allocation2] sm:$0xff]  ;;  %vm60_vm1 = vcmask 261120   ;;  %s232_s1 = smov [#allocation7]  }
  0x28   :  { %138 = vmatpush3.bf16.msra.mxu0 %v152_v1  ;;  %v43_v4 = vpack.c.bf16 %v42_v3, %v42_v3  ;;  %v133_v5 = vld [vmem:[%s301_s2] ss:$0 sm:$0xff]  ;;  %s120_s12 = sshll.u32 %s232_s1, 4  ;;  %s121_s12 = int_to_ptr.vmem [resolvable:$true] %s120_s12 }
  0x29   :  { %139 = vmatprep.subr.bf16.mxu0 %v230_v0  ;;  %s198_s13 = scalar_lea.vmem %s121_s12, 64  ;;  %p203_p3 = scmp.lt.s32.totalorder %s121_s12, %s121_s12 }
  0x2a   :  { %p199_p2 = scmp.ne.s32.totalorder %s121_s12, %s198_s13  ;;  %p204_p4 = scmp.lt.s32.totalorder %s198_s13, %s198_s13 }
  0x2c   :  { %140 = vmatpush3.bf16.msra.mxu0 %v153_v2  ;;  %p205_p5 = por %p204_p4, %p203_p3 }
  0x2e   :  { %p206_p6 = pnand %p205_p5, %p199_p2 }
  0x2f   :  { %142 = vmatmul.mubr.msk.bf16.vlgmr.msra.gmra.mrb[0].mxu0 %vm60_vm1, %v43_v4 }
 0x102   :  { %v98_v6 = vpop.f32.mrb[0].mxu0 }
 0x103   :  { %v111_v7 = vmul.f32 %v133_v5, %v98_v6  ;;  %v143_v8 = vpop.f32.mrb[1].mxu0 }
 0x104   :  { %v101_v9 = vpop.f32.mrb[2].mxu0 }
 0x105   :  { %v112_v10 = vpack.c.bf16 %v111_v7, %v111_v7  ;;  %v144_v11 = vpop.f32.mrb[3].mxu0 }
 0x107   :  { %113 = vst [vmem:[#allocation7] sm:$0xf] %v112_v10 }
 0x108   :  { %209 = shalt.err (!%p206_p6)
}
 0x109   :  { %s210_s2 = scalar_lea.hbm %s302_s3, 64 }
 0x10a   :  { %p211_p7 = scmp.ne.s32.totalorder %s302_s3, %s210_s2  ;;  %p214_p8 = scmp.lt.u32.totalorder %s210_s2, %s302_s3 }
 0x10c   :  { %p216_p9 = pnand %p214_p8, %p211_p7 }
 0x10e   :  { %219 = shalt.err (!%p216_p9)
}
 0x10f   :  { %123 = dma.vmem_to_hbm [thread:$0]  %s121_s12, 64, %s302_s3, [#allocation4]  }
 0x110   :  { %224 = dma.done.wait [#allocation4], 64  }
 0x111   :  { %225 = vsyncadd [#allocation4], 4294967232 }
 0x112   :  { %127 = vsyncpa [#allocation3], 1 }
 0x113   :  { %128 = vsyncpa [#allocation6], 1 }
 0x114   :  { %129 = vsyncpa [#allocation4], 1 }

</bundles_post_ra>
